<compile_context>
chip_gen: v7x
topology: tpu7x:2x2x1
jax: 0.10.0
libtpu: 0.0.40
codegen_flags: <defaults>
</compile_context>

<pallas_src>
import functools

import jax
import jax.numpy as jnp
from jax.experimental import pallas as pl
from jax.experimental.pallas import tpu as pltpu

LN_EPS = 1e-5
# Stay comfortably under the 32 MiB default scoped-VMEM limit (safe on v7x's
# 64 MiB physical VMEM as well as v5e/v6e).
_VMEM_BUDGET = 24 * 1024 * 1024

# Whole-array, resident-in-VMEM spec for LayerNorm/Linear parameters: loaded
# once per pallas_call, not re-streamed / double-buffered per grid step.
_PARAM_SPEC = pl.BlockSpec(memory_space=pltpu.MemorySpace.VMEM)


def _round_up(x, m):
    return (x + m - 1) // m * m


def _pick_row_tile(M, Din, Dout, want=512):
    """Row tile: large enough to feed the MXU rows, small enough that
    2x(input tile) + 2x(Dout-wide tile) + resident params fit the VMEM budget."""
    tm = min(want, _round_up(M, 8))
    const_bytes = (Din * Dout + 2 * Din + Dout) * 4
    while tm > 8:
        need = (2 * tm * Din + 2 * tm * Dout) * 4 + const_bytes
        if need <= _VMEM_BUDGET:
            break
        tm = max(8, _round_up(tm // 2, 8))
    return tm


# --------------------------------------------------------------------------
# Pallas kernel 1: fused LayerNorm + Linear   y = (LN(x) * g + b) @ W + bias
# --------------------------------------------------------------------------
def _ln_linear_kernel(x_ref, g_ref, b_ref, w_ref, bias_ref, o_ref):
    x = x_ref[...].astype(jnp.float32)
    mean = jnp.mean(x, axis=-1, keepdims=True)
    xc = x - mean
    var = jnp.mean(xc * xc, axis=-1, keepdims=True)
    xn = xc * jax.lax.rsqrt(var + LN_EPS)
    xn = xn * g_ref[...].astype(jnp.float32) + b_ref[...].astype(jnp.float32)
    y = jnp.dot(xn, w_ref[...].astype(jnp.float32),
                preferred_element_type=jnp.float32) + bias_ref[...].astype(jnp.float32)
    o_ref[...] = y.astype(o_ref.dtype)


def ln_linear(x, gamma, beta, w, bias, *, row_tile=512):
    """x: (M, Din), w: (Din, Dout) -> (M, Dout). LayerNorm over last dim, matmul."""
    M, Din = x.shape
    Dout = w.shape[1]
    tm = _pick_row_tile(M, Din, Dout, want=row_tile)
    Mp = _round_up(M, tm)
    if Mp != M:
        x = jnp.pad(x, ((0, Mp - M), (0, 0)))
    out = pl.pallas_call(
        _ln_linear_kernel,
        out_shape=jax.ShapeDtypeStruct((Mp, Dout), x.dtype),
        grid_spec=pl.GridSpec(
            grid=(Mp // tm,),
            in_specs=[
                pl.BlockSpec((tm, Din), lambda i: (i, 0)),   # activations: tiled over M
                _PARAM_SPEC,  # gamma  (resident)
                _PARAM_SPEC,  # beta   (resident)
                _PARAM_SPEC,  # W      (resident)
                _PARAM_SPEC,  # bias   (resident)
            ],
            out_specs=pl.BlockSpec((tm, Dout), lambda i: (i, 0)),
        ),
        compiler_params=pltpu.CompilerParams(dimension_semantics=("parallel",)),
    )(x, gamma.reshape(1, Din), beta.reshape(1, Din), w, bias.reshape(1, Dout))
    return out[:M] if Mp != M else out


# --------------------------------------------------------------------------
# Pallas kernel 2: fused head + loss
#   sum(((LN(x) * g + b) @ W + bias - target)^2), accumulated over an
#   "arbitrary" reduction grid into a (1, 1) VMEM scratch.
# --------------------------------------------------------------------------
def _ln_linear_sse_kernel(x_ref, g_ref, b_ref, w_ref, bias_ref, t_ref,
                          o_ref, acc_ref, *, m_valid, tm):
    i = pl.program_id(0)

    @pl.when(i == 0)
    def _():
        acc_ref[...] = jnp.zeros_like(acc_ref)

    x = x_ref[...].astype(jnp.float32)
    mean = jnp.mean(x, axis=-1, keepdims=True)
    xc = x - mean
    var = jnp.mean(xc * xc, axis=-1, keepdims=True)
    xn = xc * jax.lax.rsqrt(var + LN_EPS)
    xn = xn * g_ref[...].astype(jnp.float32) + b_ref[...].astype(jnp.float32)
    y = jnp.dot(xn, w_ref[...].astype(jnp.float32),
                preferred_element_type=jnp.float32) + bias_ref[...].astype(jnp.float32)
    d = y - t_ref[...].astype(jnp.float32)
    # Zero out padded rows so they do not contribute to the sum.
    row = jax.lax.broadcasted_iota(jnp.int32, d.shape, 0) + i * tm
    d = jnp.where(row < m_valid, d, 0.0)
    acc_ref[...] += jnp.sum(d * d)

    @pl.when(i == pl.num_programs(0) - 1)
    def _():
        o_ref[...] = acc_ref[...]


def ln_linear_sse(x, gamma, beta, w, bias, target, *, row_tile=512):
    """Returns scalar sum((head(x) - target)^2); head output never hits HBM."""
    M, Din = x.shape
    Dout = w.shape[1]
    assert target.shape == (M, Dout)
    tm = _pick_row_tile(M, Din, Dout, want=row_tile)
    Mp = _round_up(M, tm)
    if Mp != M:
        pad = ((0, Mp - M), (0, 0))
        x = jnp.pad(x, pad)
        target = jnp.pad(target, pad)
    kernel = functools.partial(_ln_linear_sse_kernel, m_valid=M, tm=tm)
    out = pl.pallas_call(
        kernel,
        out_shape=jax.ShapeDtypeStruct((1, 1), jnp.float32),
        grid_spec=pltpu.PrefetchScalarGridSpec(
            num_scalar_prefetch=0,
            grid=(Mp // tm,),
            in_specs=[
                pl.BlockSpec((tm, Din), lambda i: (i, 0)),    # activations
                _PARAM_SPEC, _PARAM_SPEC, _PARAM_SPEC, _PARAM_SPEC,
                pl.BlockSpec((tm, Dout), lambda i: (i, 0)),   # target
            ],
            out_specs=pl.BlockSpec((1, 1), lambda i: (0, 0)),
            scratch_shapes=[pltpu.VMEM((1, 1), jnp.float32)],
        ),
        compiler_params=pltpu.CompilerParams(dimension_semantics=("arbitrary",)),
    )(x, gamma.reshape(1, Din), beta.reshape(1, Din), w, bias.reshape(1, Dout), target)
    return out[0, 0]


# --------------------------------------------------------------------------
# Pallas kernel 3: row gather (torch.index_select along dim 0)
#   Scalar-prefetch DMA gather: indices prefetched to SMEM, source stays in
#   HBM, one (1, D) row is DMA'd per grid step and pipelined.
# --------------------------------------------------------------------------
def _gather_rows_kernel(idx_ref, src_ref, out_ref):
    del idx_ref  # only consumed by the index_maps
    out_ref[...] = src_ref[...]


def gather_rows(src, idx):
    """out[j] = src[idx[j]]; src: (R, D), idx: (n,) int32 -> (n, D)."""
    n = idx.shape[0]
    D = src.shape[1]
    return pl.pallas_call(
        _gather_rows_kernel,
        out_shape=jax.ShapeDtypeStruct((n, D), src.dtype),
        grid_spec=pltpu.PrefetchScalarGridSpec(
            num_scalar_prefetch=1,
            grid=(n,),
            in_specs=[pl.BlockSpec((1, D), lambda i, idx: (idx[i], 0))],
            out_specs=pl.BlockSpec((1, D), lambda i, idx: (i, 0)),
        ),
        compiler_params=pltpu.CompilerParams(dimension_semantics=("arbitrary",)),
    )(idx, src)


# --------------------------------------------------------------------------
# Stand-in backbone (glue + Pallas ln_linear)
# --------------------------------------------------------------------------
def _patchify(imgs, p):
    B, C, H, W = imgs.shape
    gh, gw = H // p, W // p
    x = imgs.reshape(B, C, gh, p, gw, p)
    x = x.transpose(0, 2, 4, 1, 3, 5)              # B, gh, gw, C, p, p
    return x.reshape(B, gh * gw, C * p * p)


def stub_backbone_tokens(crops, params):
    # TODO(synk): the real pretrained dinov2 ViT teacher and RWKV-dinov2 student
    # backbones are external torch.hub checkpoints; replaced with a deterministic
    # patch-embed (LayerNorm + Linear Pallas kernel) stand-in.
    B = crops.shape[0]
    patches = _patchify(crops, params["patch_size"])            # (B, N, C*p*p)  glue
    _, N, Dp = patches.shape
    tok = ln_linear(patches.reshape(B * N, Dp),
                    params["g_e"], params["b_e"], params["w_e"], params["bias_e"])
    return tok.reshape(B, N, -1)


def cls_from_tokens(tok, params):
    return jnp.mean(tok, axis=1) + params["cls_token"][None, :]


# --------------------------------------------------------------------------
# MetaArch.forward
# --------------------------------------------------------------------------
def meta_arch_forward(params, cfg, inputs):
    crops = inputs["collated_global_crops"]
    masks = inputs["collated_masks"]
    mask_idx = inputs["mask_indices_list"]
    n_masked = int(mask_idx.shape[0])
    # NOTE: `upperbound` only sized a zero scratch buffer in the reference that is
    # immediately re-sliced to [:n_masked]; it is intentionally not materialized.

    # ---- teacher output (frozen) ----
    t_tok = stub_backbone_tokens(crops, params["teacher"])      # (B, N, Dt)
    t_cls = cls_from_tokens(t_tok, params["teacher"])           # (B, Dt)
    B, N, Dt = t_tok.shape
    t_patch_masked = gather_rows(t_tok.reshape(B * N, Dt), mask_idx)        # Pallas gather

    # ---- student output: embed once, mask-token substitution on a copy ----
    s_tok_unmask = stub_backbone_tokens(crops, params["student"])           # (B, N, Ds)
    Ds = s_tok_unmask.shape[-1]
    s_cls_unmask = cls_from_tokens(s_tok_unmask, params["student"])         # (B, Ds)
    if cfg["mask_probability"] > 0:
        s_tok_masked = jnp.where(masks[..., None],
                                 params["student"]["mask_token"][None, None, :],
                                 s_tok_unmask)
    else:
        s_tok_masked = s_tok_unmask
    s_patch_masked = gather_rows(s_tok_masked.reshape(B * N, Ds), mask_idx)  # Pallas gather

    # ---- heads fused with their MSE targets (sum-of-squared-error kernels) ----
    ss_cls = ln_linear_sse(s_cls_unmask, *params["token_head"], t_cls)
    ss_fea = ln_linear_sse(s_tok_unmask.reshape(B * N, Ds), *params["fea_head"],
                           t_tok.reshape(B * N, Dt))
    ss_patch = ln_linear_sse(s_patch_masked, *params["patch_head"], t_patch_masked)

    # MSE(cat(cls, patches)) == (sum_sq_cls + sum_sq_patches) / (B * (N+1) * Dt)
    distill_token = ss_cls / (B * Dt)
    distill_fea = (ss_cls + ss_fea) / (B * (N + 1) * Dt)
    patch_mse = ss_patch / (n_masked * Dt)

    token_loss = cfg["lambda_token"] * distill_token
    fea_loss = cfg["lambda_fea"] * distill_fea
    patch_loss = cfg["lambda_patch"] * patch_mse
    total_loss = patch_loss + fea_loss + token_loss
    return {"patch_loss": patch_loss, "fea_loss": fea_loss,
            "token_loss": token_loss, "loss": total_loss}


# --------------------------------------------------------------------------
# deterministic parameter init
# --------------------------------------------------------------------------
def init_params(key, C, p, Ds, Dt):
    ks = jax.random.split(key, 9)
    Dp = C * p * p

    def nrm(k, shp, s=0.02):
        return (s * jax.random.normal(k, shp)).astype(jnp.float32)

    def backbone_params(kw, km, kc, D):
        return dict(patch_size=p,
                    g_e=jnp.ones((Dp,), jnp.float32),
                    b_e=jnp.zeros((Dp,), jnp.float32),
                    w_e=nrm(kw, (Dp, D)),
                    bias_e=jnp.zeros((D,), jnp.float32),
                    mask_token=nrm(km, (D,)),
                    cls_token=nrm(kc, (D,)))

    def head(k):  # (gamma, beta, W, bias) for LayerNorm(Ds) + Linear(Ds -> Dt)
        return (jnp.ones((Ds,), jnp.float32), jnp.zeros((Ds,), jnp.float32),
                nrm(k, (Ds, Dt)), jnp.zeros((Dt,), jnp.float32))

    return dict(student=backbone_params(ks[0], ks[1], ks[2], Ds),
                teacher=backbone_params(ks[3], ks[4], ks[5], Dt),
                patch_head=head(ks[6]), token_head=head(ks[7]), fea_head=head(ks[8]))


if __name__ == "__main__":
    key = jax.random.PRNGKey(0)
    B, C, H, W = 2, 3, 32, 32
    p = 8
    N = (H // p) * (W // p)        # 16 patches per crop -> 32 patch tokens total
    Ds, Dt = 128, 256              # lane-dense student / teacher embed dims
    n_masked, upperbound = 8, 12

    k_img, k_par = jax.random.split(key)
    crops = jax.random.normal(k_img, (B, C, H, W), jnp.float32)

    mask_indices_list = jnp.array([1, 3, 6, 10, 17, 20, 25, 30], dtype=jnp.int32)
    masks = jnp.zeros((B * N,), jnp.bool_).at[mask_indices_list].set(True).reshape(B, N)

    params = init_params(k_par, C, p, Ds, Dt)
    cfg = dict(mask_probability=0.5, lambda_token=1.0, lambda_fea=0.5, lambda_patch=2.0)

    inputs = dict(collated_global_crops=crops,
                  collated_masks=masks,
                  mask_indices_list=mask_indices_list,
                  upperbound=upperbound)

    loss_dict = meta_arch_forward(params, cfg, inputs)
    jax.block_until_ready(loss_dict["loss"])
    print("KERNEL_OK")
</pallas_src>

<mosaic_0001>
module attributes {stable_mosaic.version = 11 : i64} {
  func.func @_ln_linear_kernel(%arg0: i32, %arg1: memref<32x192xf32, #tpu.memory_space<vmem>>, %arg2: memref<1x192xf32, #tpu.memory_space<vmem>>, %arg3: memref<1x192xf32, #tpu.memory_space<vmem>>, %arg4: memref<192x256xf32, #tpu.memory_space<vmem>>, %arg5: memref<1x256xf32, #tpu.memory_space<vmem>>, %arg6: memref<32x256xf32, #tpu.memory_space<vmem>>) attributes {dimension_semantics = [#tpu.dimension_semantics<parallel>], iteration_bounds = array<i64: 1>, scalar_prefetch = 0 : i64, scratch_operands = 0 : i64, tpu.core_type = #tpu.core_type<tc>, window_params = [{transform_indices = @transform_0, window_bounds = array<i64: 32, 192>}, {pipeline_mode = #tpu.pipeline_mode<synchronous>, transform_indices = @transform_1, window_bounds = array<i64: 1, 192>}, {pipeline_mode = #tpu.pipeline_mode<synchronous>, transform_indices = @transform_2, window_bounds = array<i64: 1, 192>}, {pipeline_mode = #tpu.pipeline_mode<synchronous>, transform_indices = @transform_3, window_bounds = array<i64: 192, 256>}, {pipeline_mode = #tpu.pipeline_mode<synchronous>, transform_indices = @transform_4, window_bounds = array<i64: 1, 256>}, {transform_indices = @transform_5, window_bounds = array<i64: 32, 256>}]} {
    %c0 = arith.constant 0 : index
    %c0_0 = arith.constant 0 : index
    %0 = vector.load %arg1[%c0, %c0_0] : memref<32x192xf32, #tpu.memory_space<vmem>>, vector<32x192xf32>
    %cst = arith.constant dense<0.000000e+00> : vector<32xf32>
    %1 = vector.multi_reduction <add>, %0, %cst [1] : vector<32x192xf32> to vector<32xf32>
    %2 = vector.shape_cast %1 : vector<32xf32> to vector<32x1xf32>
    %cst_1 = arith.constant 1.920000e+02 : f32
    %3 = vector.broadcast %cst_1 : f32 to vector<32x1xf32>
    %4 = arith.divf %2, %3 : vector<32x1xf32>
    %5 = vector.broadcast %4 : vector<32x1xf32> to vector<32x192xf32>
    %6 = arith.subf %0, %5 : vector<32x192xf32>
    %7 = arith.mulf %6, %6 : vector<32x192xf32>
    %cst_2 = arith.constant dense<0.000000e+00> : vector<32xf32>
    %8 = vector.multi_reduction <add>, %7, %cst_2 [1] : vector<32x192xf32> to vector<32xf32>
    %9 = vector.shape_cast %8 : vector<32xf32> to vector<32x1xf32>
    %cst_3 = arith.constant 1.920000e+02 : f32
    %10 = vector.broadcast %cst_3 : f32 to vector<32x1xf32>
    %11 = arith.divf %9, %10 : vector<32x1xf32>
    %cst_4 = arith.constant 9.99999974E-6 : f32
    %12 = vector.broadcast %cst_4 : f32 to vector<32x1xf32>
    %13 = arith.addf %11, %12 : vector<32x1xf32>
    %14 = math.rsqrt %13 : vector<32x1xf32>
    %15 = vector.broadcast %14 : vector<32x1xf32> to vector<32x192xf32>
    %16 = arith.mulf %6, %15 : vector<32x192xf32>
    %c0_5 = arith.constant 0 : index
    %c0_6 = arith.constant 0 : index
    %17 = vector.load %arg2[%c0_5, %c0_6] : memref<1x192xf32, #tpu.memory_space<vmem>>, vector<1x192xf32>
    %18 = vector.broadcast %17 : vector<1x192xf32> to vector<32x192xf32>
    %19 = arith.mulf %16, %18 : vector<32x192xf32>
    %c0_7 = arith.constant 0 : index
    %c0_8 = arith.constant 0 : index
    %20 = vector.load %arg3[%c0_7, %c0_8] : memref<1x192xf32, #tpu.memory_space<vmem>>, vector<1x192xf32>
    %21 = vector.broadcast %20 : vector<1x192xf32> to vector<32x192xf32>
    %22 = arith.addf %19, %21 : vector<32x192xf32>
    %c0_9 = arith.constant 0 : index
    %c0_10 = arith.constant 0 : index
    %23 = vector.load %arg4[%c0_9, %c0_10] : memref<192x256xf32, #tpu.memory_space<vmem>>, vector<192x256xf32>
    %cst_11 = arith.constant dense<0.000000e+00> : vector<32x256xf32>
    %24 = tpu.matmul %22, %23, %cst_11 {dimension_numbers = #tpu.dot_dimension_numbers<[1], [0], [0], [1], [0, 0, 1, 1], [], []>} : vector<32x192xf32>, vector<192x256xf32>, vector<32x256xf32> -> vector<32x256xf32>
    %c0_12 = arith.constant 0 : index
    %c0_13 = arith.constant 0 : index
    %25 = vector.load %arg5[%c0_12, %c0_13] : memref<1x256xf32, #tpu.memory_space<vmem>>, vector<1x256xf32>
    %26 = vector.broadcast %25 : vector<1x256xf32> to vector<32x256xf32>
    %27 = arith.addf %24, %26 : vector<32x256xf32>
    %c0_14 = arith.constant 0 : index
    %c0_15 = arith.constant 0 : index
    %28 = vector.load %arg6[%c0_14, %c0_15] : memref<32x256xf32, #tpu.memory_space<vmem>>, vector<32x256xf32>
    tpu.vector_store %arg6[%c0_14, %c0_15], %27 {strides = array<i32>} : memref<32x256xf32, #tpu.memory_space<vmem>>, vector<32x256xf32>,
    return
  }
  func.func @transform_0(%arg0: i32) -> (i32, i32) {
    %c0_i32 = arith.constant 0 : i32
    %c0_i32_0 = arith.constant 0 : i32
    return %arg0, %c0_i32 : i32, i32
  }
  func.func @transform_1(%arg0: i32) -> (i32, i32) {
    %c0_i32 = arith.constant 0 : i32
    %c0_i32_0 = arith.constant 0 : i32
    %c0_i32_1 = arith.constant 0 : i32
    return %c0_i32, %c0_i32_0 : i32, i32
  }
  func.func @transform_2(%arg0: i32) -> (i32, i32) {
    %c0_i32 = arith.constant 0 : i32
    %c0_i32_0 = arith.constant 0 : i32
    %c0_i32_1 = arith.constant 0 : i32
    return %c0_i32, %c0_i32_0 : i32, i32
  }
  func.func @transform_3(%arg0: i32) -> (i32, i32) {
    %c0_i32 = arith.constant 0 : i32
    %c0_i32_0 = arith.constant 0 : i32
    %c0_i32_1 = arith.constant 0 : i32
    return %c0_i32, %c0_i32_0 : i32, i32
  }
  func.func @transform_4(%arg0: i32) -> (i32, i32) {
    %c0_i32 = arith.constant 0 : i32
    %c0_i32_0 = arith.constant 0 : i32
    %c0_i32_1 = arith.constant 0 : i32
    return %c0_i32, %c0_i32_0 : i32, i32
  }
  func.func @transform_5(%arg0: i32) -> (i32, i32) {
    %c0_i32 = arith.constant 0 : i32
    %c0_i32_0 = arith.constant 0 : i32
    return %arg0, %c0_i32 : i32, i32
  }
}

</mosaic_0001>

<bundles_post_ra>
// kernel: tpu_custom_call.1
= control target key start
LH: loop header
LB: loop body
LE: loop exit
PB: predicated region body
PF: predicated region fallthrough
CT: control target
= control target key end

     0   :  { %10 = vsyncpa [#allocation3], 0  ;;  %s692_s0 = inlined_call_operand.hbm [shape: f32[32,192], index: 0, kind: input, shape index: {}]   ;;  %s693_s1 = inlined_call_operand.vmem [shape: f32[1,192], index: 1, kind: input, shape index: {}]   ;;  %s694_s2 = inlined_call_operand.vmem [shape: f32[1,192], index: 2, kind: input, shape index: {}]   ;;  %s695_s3 = inlined_call_operand.hbm [shape: f32[192,256], index: 3, kind: input, shape index: {}]   ;;  %s696_s4 = inlined_call_operand.vmem [shape: f32[1,256], index: 4, kind: input, shape index: {}]   ;;  %s697_s5 = inlined_call_operand.hbm [shape: f32[32,256], index: 5, kind: output, shape index: {}]  }
   0x1   :  { %11 = vsyncpa [#allocation6], 0 }
   0x2   :  { %12 = vsyncpa [#allocation4], 0  ;;  %s519_s18 = smov [#allocation2]   ;;  %s447_s22 = scalar_lea.hbm %s692_s0, 1024 }
   0x3   :  { %s18_s19 = sshll.u32 %s519_s18, 4  ;;  %p448_p0 = scmp.ne.s32.totalorder %s692_s0, %s447_s22  ;;  %s19_s19 = int_to_ptr.vmem [resolvable:$true] %s18_s19 }
   0x4   :  { %p451_p1 = scmp.lt.u32.totalorder %s447_s22, %s692_s0 }
   0x6   :  { %p453_p2 = pnand %p451_p1, %p448_p0 }
   0x8   :  { %456 = shalt.err (!%p453_p2)
}
   0x9   :  { %s457_s27 = scalar_lea.vmem %s19_s19, 1024  ;;  %p462_p4 = scmp.lt.s32.totalorder %s19_s19, %s19_s19 }
   0xa   :  { %p458_p3 = scmp.ne.s32.totalorder %s19_s19, %s457_s27  ;;  %p463_p5 = scmp.lt.s32.totalorder %s457_s27, %s457_s27 }
   0xc   :  { %p464_p6 = por %p463_p5, %p462_p4 }
   0xe   :  { %p465_p7 = pnand %p464_p6, %p458_p3 }
  0x10   :  { %468 = shalt.err (!%p465_p7)
}
  0x11   :  { %s520_s28 = smov 256   ;;  %s521_s29 = smov 16  }
  0x12   :  { %24 = dma.hbm_to_vmem [thread:$0]  %s692_s0, 1024, %s19_s19, [#allocation3], %s520_s28, %s520_s28, %s521_s29  }
  0x13   :  { %s522_s7 = smov [#allocation5]   ;;  %s469_s11 = scalar_lea.hbm %s695_s3, 6144 }
  0x14   :  { %s34_s8 = sshll.u32 %s522_s7, 4  ;;  %p470_p8 = scmp.ne.s32.totalorder %s695_s3, %s469_s11  ;;  %s35_s8 = int_to_ptr.vmem [resolvable:$true] %s34_s8 }
  0x15   :  { %p473_p9 = scmp.lt.u32.totalorder %s469_s11, %s695_s3 }
  0x17   :  { %p475_p10 = pnand %p473_p9, %p470_p8 }
  0x19   :  { %478 = shalt.err (!%p475_p10)
}
  0x1a   :  { %s479_s16 = scalar_lea.vmem %s35_s8, 6144  ;;  %p484_p12 = scmp.lt.s32.totalorder %s35_s8, %s35_s8 }
  0x1b   :  { %p480_p11 = scmp.ne.s32.totalorder %s35_s8, %s479_s16  ;;  %p485_p13 = scmp.lt.s32.totalorder %s479_s16, %s479_s16 }
  0x1d   :  { %p486_p0 = por %p485_p13, %p484_p12 }
  0x1f   :  { %p487_p1 = pnand %p486_p0, %p480_p11 }
  0x21   :  { %490 = shalt.err (!%p487_p1)
}
  0x22   :  { %40 = dma.hbm_to_vmem [thread:$0]  %s695_s3, 6144, %s35_s8, [#allocation6], %s520_s28, %s520_s28, %s521_s29  }
  0x23   :  { %513 = dma.done.wait [#allocation3], 1024  }
  0x24   :  { %514 = vsyncadd [#allocation3], 4294966272 }
  0x25   :  { %515 = dma.done.wait [#allocation6], 6144  }
  0x26   :  { %516 = vsyncadd [#allocation6], 4294961152  ;;  %vm57_vm0 = vcmask 523264   ;;  %v584_v0 = vld [vmem:[#allocation2] sm:$0xff]  ;;  %v586_v1 = vld [vmem:[#allocation2 + $0x8] sm:$0xff]  ;;  %s523_s21 = smov [#allocation7]  }
  0x27   :  { %v588_v2 = vld [vmem:[#allocation2 + $0x10] sm:$0xff]  ;;  %v58_v3 = vsel %vm57_vm0, %v586_v1, 0.0  ;;  %v592_v4 = vld [vmem:[#allocation2 + $0x18] sm:$0xff]  ;;  %v594_v5 = vld [vmem:[#allocation2 + $0x20] sm:$0xff]  ;;  %s345_s22 = sshll.u32 %s523_s21, 4  ;;  %s346_s22 = int_to_ptr.vmem [resolvable:$true] %s345_s22 }
  0x28   :  { %v596_v6 = vld [vmem:[#allocation2 + $0x28] sm:$0xff]  ;;  %v59_v7 = vadd.f32 %v58_v3, %v584_v0  ;;  %v62_v8 = vsel %vm57_vm0, %v592_v4, 0.0  ;;  %v603_v10 = vld [vmem:[#allocation2 + $0x30] sm:$0xff]  ;;  %v605_v11 = vld [vmem:[#allocation2 + $0x38] sm:$0xff]  ;;  %p496_p3 = scmp.lt.s32.totalorder %s346_s22, %s346_s22 }
  0x29   :  { %v66_v9 = vsel %vm57_vm0, %v596_v6, 0.0  ;;  %v63_v12 = vadd.f32 %v62_v8, %v588_v2  ;;  %v70_v13 = vsel %vm57_vm0, %v605_v11, 0.0  ;;  %v172_v16 = vld [vmem:[#allocation5 + $0x8] sm:$0xff]  ;;  %v174_v17 = vld [vmem:[#allocation5 + $0x18] sm:$0xff]  ;;  %v171_v18 = vld [vmem:[#allocation5] sm:$0xff] }
  0x2a   :  { %60 = vadd.xlane.f32.xlu0 %v59_v7  ;;  %v67_v14 = vadd.f32 %v66_v9, %v594_v5  ;;  %v71_v15 = vadd.f32 %v70_v13, %v603_v10  ;;  %v362_v19 = vpack.c.bf16 %v174_v17, %v172_v16  ;;  %v173_v20 = vld [vmem:[#allocation5 + $0x10] sm:$0xff]  ;;  %v176_v21 = vld [vmem:[#allocation5 + $0x28] sm:$0xff]  ;;  %v178_v22 = vld [vmem:[#allocation5 + $0x38] sm:$0xff] }
  0x2b   :  { %64 = vadd.xlane.f32.xlu1 %v63_v12  ;;  %v364_v23 = vpack.c.bf16 %v173_v20, %v171_v18  ;;  %v366_v24 = vpack.c.bf16 %v178_v22, %v176_v21  ;;  %v175_v25 = vld [vmem:[#allocation5 + $0x20] sm:$0xff]  ;;  %v177_v26 = vld [vmem:[#allocation5 + $0x30] sm:$0xff]  ;;  %v180_v27 = vld [vmem:[#allocation5 + $0x48] sm:$0xff] }
  0x2c   :  { %363 = vmatprep.subr.bf16.mxu0 %v362_v19  ;;  %410 = vmatprep.subr.bf16.mxu1 %v362_v19  ;;  %v182_v28 = vld [vmem:[#allocation5 + $0x58] sm:$0xff]  ;;  %v368_v29 = vpack.c.bf16 %v177_v26, %v175_v25  ;;  %v179_v31 = vld [vmem:[#allocation5 + $0x40] sm:$0xff]  ;;  %v181_v32 = vld [vmem:[#allocation5 + $0x50] sm:$0xff] }
  0x2d   :  { %365 = vmatpush1.bf16.msra.mxu0 %v364_v23  ;;  %422 = vmatpush1.bf16.msra.mxu1 %v364_v23  ;;  %v370_v30 = vpack.c.bf16 %v182_v28, %v180_v27  ;;  %v184_v33 = vld [vmem:[#allocation5 + $0x68] sm:$0xff]  ;;  %v186_v34 = vld [vmem:[#allocation5 + $0x78] sm:$0xff]  ;;  %v372_v35 = vpack.c.bf16 %v181_v32, %v179_v31  ;;  %v183_v37 = vld [vmem:[#allocation5 + $0x60] sm:$0xff] }
  0x2e   :  { %68 = vadd.xlane.f32.xlu0 %v67_v14  ;;  %367 = vmatprep.subr.bf16.mxu0 %v366_v24  ;;  %v374_v36 = vpack.c.bf16 %v186_v34, %v184_v33  ;;  %v185_v38 = vld [vmem:[#allocation5 + $0x70] sm:$0xff]  ;;  %v188_v39 = vld [vmem:[#allocation5 + $0x88] sm:$0xff]  ;;  %v190_v40 = vld [vmem:[#allocation5 + $0x98] sm:$0xff] }
  0x2f   :  { %72 = vadd.xlane.f32.xlu1 %v71_v15  ;;  %411 = vmatprep.subr.bf16.mxu1 %v366_v24  ;;  %v376_v41 = vpack.c.bf16 %v185_v38, %v183_v37  ;;  %v378_v42 = vpack.c.bf16 %v190_v40, %v188_v39  ;;  %v187_v43 = vld [vmem:[#allocation5 + $0x80] sm:$0xff]  ;;  %v189_v44 = vld [vmem:[#allocation5 + $0x90] sm:$0xff]  ;;  %v192_v45 = vld [vmem:[#allocation5 + $0xa8] sm:$0xff] }
  0x30   :  { %v194_v46 = vld [vmem:[#allocation5 + $0xb8] sm:$0xff]  ;;  %v380_v47 = vpack.c.bf16 %v189_v44, %v187_v43  ;;  %v191_v49 = vld [vmem:[#allocation5 + $0xa0] sm:$0xff]  ;;  %v193_v50 = vld [vmem:[#allocation5 + $0xb0] sm:$0xff] }
  0x31   :  { %369 = vmatpush1.bf16.msra.mxu0 %v368_v29  ;;  %423 = vmatpush1.bf16.msra.mxu1 %v368_v29  ;;  %v382_v48 = vpack.c.bf16 %v194_v46, %v192_v45  ;;  %v196_v51 = vld [vmem:[#allocation5 + $0xc8] sm:$0xff]  ;;  %v198_v52 = vld [vmem:[#allocation5 + $0xd8] sm:$0xff]  ;;  %v384_v53 = vpack.c.bf16 %v193_v50, %v191_v49  ;;  %v195_v55 = vld [vmem:[#allocation5 + $0xc0] sm:$0xff] }
  0x32   :  { %371 = vmatprep.subr.bf16.mxu0 %v370_v30  ;;  %412 = vmatprep.subr.bf16.mxu1 %v370_v30  ;;  %v386_v54 = vpack.c.bf16 %v198_v52, %v196_v51  ;;  %v197_v56 = vld [vmem:[#allocation5 + $0xd0] sm:$0xff]  ;;  %v200_v26 = vld [vmem:[#allocation5 + $0xe8] sm:$0xff]  ;;  %v202_v27 = vld [vmem:[#allocation5 + $0xf8] sm:$0xff] }
  0x33   :  { %v388_v57 = vpack.c.bf16 %v197_v56, %v195_v55  ;;  %v390_v28 = vpack.c.bf16 %v202_v27, %v200_v26  ;;  %v199_v29 = vld [vmem:[#allocation5 + $0xe0] sm:$0xff]  ;;  %v201_v30 = vld [vmem:[#allocation5 + $0xf0] sm:$0xff]  ;;  %v204_v32 = vld [vmem:[#allocation5 + $0x108] sm:$0xff] }
  0x34   :  { %v392_v31 = vpack.c.bf16 %v201_v30, %v199_v29  ;;  %v206_v33 = vld [vmem:[#allocation5 + $0x118] sm:$0xff]  ;;  %v208_v38 = vld [vmem:[#allocation5 + $0x128] sm:$0xff]  ;;  %v211_v46 = vld [vmem:[#allocation5 + $0x140] sm:$0xff] }
  0x35   :  { %373 = vmatpush1.bf16.msra.mxu0 %v372_v35  ;;  %424 = vmatpush1.bf16.msra.mxu1 %v372_v35  ;;  %v394_v34 = vpack.c.bf16 %v206_v33, %v204_v32  ;;  %v203_v35 = vld [vmem:[#allocation5 + $0x100] sm:$0xff]  ;;  %v210_v39 = vld [vmem:[#allocation5 + $0x138] sm:$0xff]  ;;  %v212_v44 = vld [vmem:[#allocation5 + $0x148] sm:$0xff] }
  0x36   :  { %375 = vmatprep.subr.bf16.mxu0 %v374_v36  ;;  %413 = vmatprep.subr.bf16.mxu1 %v374_v36  ;;  %v205_v36 = vld [vmem:[#allocation5 + $0x110] sm:$0xff]  ;;  %v398_v40 = vpack.c.bf16 %v210_v39, %v208_v38  ;;  %v214_v45 = vld [vmem:[#allocation5 + $0x158] sm:$0xff]  ;;  %v216_v49 = vld [vmem:[#allocation5 + $0x168] sm:$0xff] }
  0x37   :  { %v396_v37 = vpack.c.bf16 %v205_v36, %v203_v35  ;;  %v218_v50 = vld [vmem:[#allocation5 + $0x178] sm:$0xff] }
  0x38   :  { %v406_v52 = vpack.c.bf16 %v218_v50, %v216_v49 }
  0x39   :  { %377 = vmatpush1.bf16.msra.mxu0 %v376_v41  ;;  %425 = vmatpush1.bf16.msra.mxu1 %v376_v41  ;;  %v207_v41 = vld [vmem:[#allocation5 + $0x120] sm:$0xff] }
  0x3a   :  { %379 = vmatprep.subr.bf16.mxu0 %v378_v42  ;;  %414 = vmatprep.subr.bf16.mxu1 %v378_v42  ;;  %v209_v42 = vld [vmem:[#allocation5 + $0x130] sm:$0xff] }
  0x3b   :  { %v400_v43 = vpack.c.bf16 %v209_v42, %v207_v41 }
  0x3d   :  { %381 = vmatpush1.bf16.msra.mxu0 %v380_v47  ;;  %426 = vmatpush1.bf16.msra.mxu1 %v380_v47  ;;  %v402_v47 = vpack.c.bf16 %v214_v45, %v212_v44 }
  0x3e   :  { %383 = vmatprep.subr.bf16.mxu0 %v382_v48  ;;  %415 = vmatprep.subr.bf16.mxu1 %v382_v48  ;;  %v213_v48 = vld [vmem:[#allocation5 + $0x150] sm:$0xff] }
  0x3f   :  { %v404_v51 = vpack.c.bf16 %v213_v48, %v211_v46 }
  0x41   :  { %385 = vmatpush1.bf16.msra.mxu0 %v384_v53  ;;  %427 = vmatpush1.bf16.msra.mxu1 %v384_v53  ;;  %v215_v53 = vld [vmem:[#allocation5 + $0x160] sm:$0xff] }
  0x42   :  { %387 = vmatprep.subr.bf16.mxu0 %v386_v54  ;;  %416 = vmatprep.subr.bf16.mxu1 %v386_v54  ;;  %v217_v54 = vld [vmem:[#allocation5 + $0x170] sm:$0xff] }
  0x43   :  { %v408_v55 = vpack.c.bf16 %v217_v54, %v215_v53 }
  0x45   :  { %389 = vmatpush1.bf16.msra.mxu0 %v388_v57  ;;  %428 = vmatpush1.bf16.msra.mxu1 %v388_v57 }
  0x46   :  { %391 = vmatprep.subr.bf16.mxu0 %v390_v28  ;;  %417 = vmatprep.subr.bf16.mxu1 %v390_v28 }
  0x49   :  { %393 = vmatpush1.bf16.msra.mxu0 %v392_v31  ;;  %429 = vmatpush1.bf16.msra.mxu1 %v392_v31 }
  0x4a   :  { %395 = vmatprep.subr.bf16.mxu0 %v394_v34  ;;  %418 = vmatprep.subr.bf16.mxu1 %v394_v34 }
  0x4d   :  { %397 = vmatpush1.bf16.msra.mxu0 %v396_v37  ;;  %430 = vmatpush1.bf16.msra.mxu1 %v396_v37 }
  0x4e   :  { %399 = vmatprep.subr.bf16.mxu0 %v398_v40  ;;  %419 = vmatprep.subr.bf16.mxu1 %v398_v40 }
  0x51   :  { %401 = vmatpush1.bf16.msra.mxu0 %v400_v43  ;;  %431 = vmatpush1.bf16.msra.mxu1 %v400_v43 }
  0x52   :  { %403 = vmatprep.subr.bf16.mxu0 %v402_v47  ;;  %420 = vmatprep.subr.bf16.mxu1 %v402_v47 }
  0x55   :  { %405 = vmatpush1.bf16.msra.mxu0 %v404_v51  ;;  %432 = vmatpush1.bf16.msra.mxu1 %v404_v51 }
  0x56   :  { %407 = vmatprep.subr.bf16.mxu0 %v406_v52  ;;  %421 = vmatprep.subr.bf16.mxu1 %v406_v52 }
  0x59   :  { %409 = vmatpush1.bf16.msra.mxu0 %v408_v55  ;;  %433 = vmatpush1.bf16.msra.mxu1 %v408_v55 }
  0xb7   :  { %v61_v58 = vpop.xlane.xlu0 %60 }
  0xb8   :  { %v75_v59 = vmul.f32 0.0052083335, %v61_v58  ;;  %v65_v60 = vpop.xlane.xlu1 %64  ;;  %v133_v58 = vlaneseq }
  0xb9   :  { %v76_v61 = vmul.f32 0.0052083335, %v65_v60 }
  0xba   :  { %v613_v62 = vsub.f32 %v584_v0, %v75_v59  ;;  %v616_v63 = vsub.f32 %v586_v1, %v75_v59 }
  0xbb   :  { %v619_v3 = vsub.f32 %v588_v2, %v76_v61  ;;  %v622_v7 = vsub.f32 %v592_v4, %v76_v61  ;;  %v69_v8 = vpop.xlane.xlu0 %68 }
  0xbc   :  { %v77_v9 = vmul.f32 0.0052083335, %v69_v8  ;;  %v73_v12 = vpop.xlane.xlu1 %72  ;;  %v87_v13 = vmul.f32 %v613_v62, %v613_v62  ;;  %v88_v14 = vmul.f32 %v616_v63, %v616_v63 }
  0xbd   :  { %v78_v0 = vmul.f32 0.0052083335, %v73_v12  ;;  %v89_v1 = vmul.f32 %v619_v3, %v619_v3  ;;  %v90_v2 = vmul.f32 %v622_v7, %v622_v7  ;;  %v134_v12 = vshrl.u32 %v133_v58, 7 }
  0xbe   :  { %v633_v15 = vsub.f32 %v594_v5, %v77_v9  ;;  %v636_v4 = vsub.f32 %v596_v6, %v77_v9  ;;  %v95_v16 = vsel %vm57_vm0, %v88_v14, 0.0 }
  0xbf   :  { %v640_v17 = vsub.f32 %v603_v10, %v78_v0  ;;  %v643_v18 = vsub.f32 %v605_v11, %v78_v0  ;;  %v96_v19 = vadd.f32 %v95_v16, %v87_v13  ;;  %v99_v20 = vsel %vm57_vm0, %v90_v2, 0.0 }
  0xc0   :  { %v91_v21 = vmul.f32 %v633_v15, %v633_v15  ;;  %v92_v5 = vmul.f32 %v636_v4, %v636_v4  ;;  %v100_v6 = vadd.f32 %v99_v20, %v89_v1  ;;  %v135_v2 = vsub.s32 0, %v134_v12  ;;  %v131_v20 = vld [vmem:[%s693_s1] sm:$0x3] }
  0xc1   :  { %97 = vadd.xlane.f32.xlu0 %v96_v19  ;;  %v93_v22 = vmul.f32 %v640_v17, %v640_v17  ;;  %v94_v10 = vmul.f32 %v643_v18, %v643_v18  ;;  %v139_v16 = vsub.s32 1, %v134_v12 }
  0xc2   :  { %v103_v11 = vsel %vm57_vm0, %v92_v5, 0.0  ;;  %v136_v5 = vrot.slane %v131_v20, %v135_v2 }
  0xc3   :  { %v104_v23 = vadd.f32 %v103_v11, %v91_v21  ;;  %v107_v24 = vsel %vm57_vm0, %v94_v10, 0.0  ;;  %v151_v21 = vld [vmem:[%s694_s2] sm:$0x3] }
  0xc4   :  { %v108_v25 = vadd.f32 %v107_v24, %v93_v22  ;;  %v156_v11 = vrot.slane %v151_v21, %v135_v2 }
  0xc5   :  { %101 = vadd.xlane.f32.xlu0 %v100_v6  ;;  %105 = vadd.xlane.f32.xlu1 %v104_v23  ;;  %v140_v6 = vrot.slane %v131_v20, %v139_v16  ;;  %v160_v23 = vrot.slane %v151_v21, %v139_v16 }
  0xc9   :  { %109 = vadd.xlane.f32.xlu1 %v108_v25 }
 0x14e   :  { %v98_v56 = vpop.xlane.xlu0 %97 }
 0x14f   :  { %v111_v57 = vmul.f32 0.0052083335, %v98_v56 }
 0x151   :  { %v115_v59 = vadd.f32 1e-05, %v111_v57 }
 0x152   :  { %v106_v60 = vpop.xlane.xlu1 %105  ;;  %v102_v61 = vpop.xlane.xlu0 %101 }
 0x153   :  { %439 = vrsqrt.f32 %v115_v59  ;;  %v113_v8 = vmul.f32 0.0052083335, %v106_v60  ;;  %v112_v9 = vmul.f32 0.0052083335, %v102_v61 }
 0x155   :  { %v117_v13 = vadd.f32 1e-05, %v113_v8  ;;  %v116_v14 = vadd.f32 1e-05, %v112_v9 }
 0x156   :  { %v110_v0 = vpop.xlane.xlu1 %109 }
 0x157   :  { %441 = vrsqrt.f32 %v117_v13  ;;  %v114_v1 = vmul.f32 0.0052083335, %v110_v0 }
 0x158   :  { %443 = vrsqrt.f32 %v116_v14 }
 0x159   :  { %v118_v19 = vadd.f32 1e-05, %v114_v1 }
 0x15b   :  { %445 = vrsqrt.f32 %v118_v19 }
 0x15d   :  { %v440_v22 = vpop.eup %439 }
 0x15e   :  { %v124_v10 = vmul.f32 %v440_v22, %v616_v63  ;;  %v123_v24 = vmul.f32 %v440_v22, %v613_v62 }
 0x160   :  { %v144_v25 = vmul.f32 %v140_v6, %v124_v10  ;;  %v143_v26 = vmul.f32 %v136_v5, %v123_v24 }
 0x161   :  { %v442_v27 = vpop.eup %441 }
 0x162   :  { %v444_v28 = vpop.eup %443  ;;  %v164_v29 = vadd.f32 %v160_v23, %v144_v25  ;;  %v163_v30 = vadd.f32 %v156_v11, %v143_v26  ;;  %v128_v31 = vmul.f32 %v442_v27, %v636_v4  ;;  %v127_v32 = vmul.f32 %v442_v27, %v633_v15 }
 0x163   :  { %v126_v33 = vmul.f32 %v444_v28, %v622_v7  ;;  %v125_v34 = vmul.f32 %v444_v28, %v619_v3 }
 0x164   :  { %358 = vmatprep.mubr.msk.f32.mxu0 %vm57_vm0, %v164_v29  ;;  %v148_v63 = vmul.f32 %v140_v6, %v128_v31  ;;  %v147_v35 = vmul.f32 %v136_v5, %v127_v32 }
 0x165   :  { %v446_v36 = vpop.eup %445  ;;  %308 = vmatmul.mubr.f32.vlgmr.msra.gmra.mrb[0].mxu0 %v163_v30  ;;  %v146_v62 = vmul.f32 %v140_v6, %v126_v33  ;;  %v145_v37 = vmul.f32 %v136_v5, %v125_v34 }
 0x166   :  { %v168_v38 = vadd.f32 %v160_v23, %v148_v63  ;;  %v167_v39 = vadd.f32 %v156_v11, %v147_v35  ;;  %v130_v40 = vmul.f32 %v446_v36, %v643_v18  ;;  %v129_v4 = vmul.f32 %v446_v36, %v640_v17  ;;  %v219_v18 = vld [vmem:[%s696_s4] sm:$0x3]  ;;  %s491_s4 = scalar_lea.vmem %s346_s22, 1024 }
 0x167   :  { %v166_v41 = vadd.f32 %v160_v23, %v146_v62  ;;  %v165_v15 = vadd.f32 %v156_v11, %v145_v37  ;;  %v224_v17 = vrot.slane %v219_v18, %v135_v2  ;;  %v228_v44 = vrot.slane %v219_v18, %v139_v16  ;;  %p492_p2 = scmp.ne.s32.totalorder %s346_s22, %s491_s4  ;;  %p497_p4 = scmp.lt.s32.totalorder %s491_s4, %s491_s4 }
 0x168   :  { %360 = vmatprep.mubr.msk.f32.mxu1 %vm57_vm0, %v168_v38  ;;  %v150_v7 = vmul.f32 %v140_v6, %v130_v40  ;;  %v149_v3 = vmul.f32 %v136_v5, %v129_v4 }
 0x169   :  { %359 = vmatprep.mubr.msk.f32.mxu0 %vm57_vm0, %v166_v41  ;;  %320 = vmatmul.mubr.f32.vlgmr.msra.gmra.mrb[0].mxu1 %v167_v39  ;;  %p498_p5 = por %p497_p4, %p496_p3 }
 0x16a   :  { %314 = vmatmul.mubr.f32.gmra.mrb[2].mxu0 %v165_v15  ;;  %v170_v42 = vadd.f32 %v160_v23, %v150_v7  ;;  %v169_v43 = vadd.f32 %v156_v11, %v149_v3 }
 0x16b   :  { %p499_p6 = pnand %p498_p5, %p492_p2 }
 0x16c   :  { %361 = vmatprep.mubr.msk.f32.mxu1 %vm57_vm0, %v170_v42 }
 0x16d   :  { %326 = vmatmul.mubr.f32.gmra.mrb[2].mxu1 %v169_v43 }
 0x238   :  { %v309_v45 = vpop.f32.mrb[0].mxu0 }
 0x239   :  { %v310_v46 = vadd.f32 %v309_v45, %v224_v17  ;;  %v311_v47 = vpop.f32.mrb[1].mxu0 }
 0x23a   :  { %v312_v48 = vadd.f32 %v311_v47, %v228_v44 }
 0x23b   :  { %332 = vst [vmem:[#allocation7] sm:$0xff] %v310_v46 }
 0x23c   :  { %333 = vst [vmem:[#allocation7 + $0x8] sm:$0xff] %v312_v48  ;;  %v321_v49 = vpop.f32.mrb[0].mxu1 }
 0x23d   :  { %v315_v50 = vpop.f32.mrb[2].mxu0  ;;  %v322_v51 = vadd.f32 %v321_v49, %v224_v17  ;;  %v323_v52 = vpop.f32.mrb[1].mxu1 }
 0x23e   :  { %v316_v53 = vadd.f32 %v315_v50, %v224_v17  ;;  %v317_v54 = vpop.f32.mrb[3].mxu0  ;;  %v324_v55 = vadd.f32 %v323_v52, %v228_v44 }
 0x23f   :  { %336 = vst [vmem:[#allocation7 + $0x20] sm:$0xff] %v322_v51  ;;  %v318_v56 = vadd.f32 %v317_v54, %v228_v44 }
 0x240   :  { %334 = vst [vmem:[#allocation7 + $0x10] sm:$0xff] %v316_v53  ;;  %337 = vst [vmem:[#allocation7 + $0x28] sm:$0xff] %v324_v55  ;;  %v327_v57 = vpop.f32.mrb[2].mxu1 }
 0x241   :  { %335 = vst [vmem:[#allocation7 + $0x18] sm:$0xff] %v318_v56  ;;  %v328_v58 = vadd.f32 %v327_v57, %v224_v17  ;;  %v329_v59 = vpop.f32.mrb[3].mxu1 }
 0x242   :  { %v330_v60 = vadd.f32 %v329_v59, %v228_v44 }
 0x243   :  { %338 = vst [vmem:[#allocation7 + $0x30] sm:$0xff] %v328_v58 }
 0x244   :  { %339 = vst [vmem:[#allocation7 + $0x38] sm:$0xff] %v330_v60 }
 0x245   :  { %502 = shalt.err (!%p499_p6)
}
 0x246   :  { %s503_s25 = scalar_lea.hbm %s697_s5, 1024 }
 0x247   :  { %p504_p7 = scmp.ne.s32.totalorder %s697_s5, %s503_s25  ;;  %p507_p8 = scmp.lt.u32.totalorder %s503_s25, %s697_s5 }
 0x249   :  { %p509_p9 = pnand %p507_p8, %p504_p7 }
 0x24b   :  { %512 = shalt.err (!%p509_p9)
}
 0x24c   :  { %351 = dma.vmem_to_hbm [thread:$0]  %s346_s22, 1024, %s697_s5, [#allocation4], %s520_s28, %s520_s28, %s521_s29  }
 0x24d   :  { %517 = dma.done.wait [#allocation4], 1024  }
 0x24e   :  { %518 = vsyncadd [#allocation4], 4294966272 }
 0x24f   :  { %355 = vsyncpa [#allocation3], 1 }
 0x250   :  { %356 = vsyncpa [#allocation6], 1 }
 0x251   :  { %357 = vsyncpa [#allocation4], 1 }

</bundles_post_ra>
